<compile_context>
chip_gen: v5e
topology: v5e:2x2
jax: 0.10.0
libtpu: 0.0.40
codegen_flags: <defaults>
</compile_context>

<pallas_src>
import math
import functools

import jax
import jax.numpy as jnp
from jax.experimental import pallas as pl
from jax.experimental.pallas import tpu as pltpu

HIDDEN = 16


def _mlp_kernel(x_ref, w1_ref, b1_ref, w2_ref, b2_ref, o_ref):
    # hidden = tanh(x @ W1 + b1): MXU matmul, VPU add, EUP tanh.
    h = jnp.dot(x_ref[...], w1_ref[...], preferred_element_type=jnp.float32)
    h = jnp.tanh(h + b1_ref[...])
    # Second layer: (Tb,16) x (16,1) would waste the whole systolic array, so
    # do it as a VPU multiply against the w2 row + lane reduce (XLU slot).
    y = jnp.sum(h * w2_ref[...], axis=-1, keepdims=True) + b2_ref[0]
    o_ref[...] = y.astype(o_ref.dtype)


def _pick_batch_tile(batch, input_size):
    # Budget double-buffered x + out tiles against ~8 MiB of VMEM so the same
    # tile size is safe on v7x (64 MiB total / 32 MiB scoped default) even if
    # input_size is large; for input_size=32 this gives the full 1024 rows.
    bytes_per_row = 4 * (input_size + HIDDEN + 1)
    max_rows = (8 * 1024 * 1024) // (2 * bytes_per_row)
    tb = min(1024, max(batch, 1), max(max_rows, 8))
    tb = max(8, ((tb + 7) // 8) * 8)  # sublane multiple of 8
    return tb


@jax.jit
def second_modele_forward(x, w1, b1, w2, b2):
    """x: (B, inputSize) f32; w1: (inputSize, 16); b1: (1, 16) or (16,);
    w2: (16, 1); b2: (1, 1) or (1,). Returns (B, 1) f32."""
    B, input_size = x.shape
    tb = _pick_batch_tile(B, input_size)
    b_pad = pl.cdiv(B, tb) * tb
    x_p = x if b_pad == B else jnp.pad(x, ((0, b_pad - B), (0, 0)))

    b1_row = jnp.reshape(b1, (1, HIDDEN)).astype(jnp.float32)
    w2_row = jnp.reshape(w2, (1, HIDDEN)).astype(jnp.float32)   # (16,1) -> row
    b2_vec = jnp.reshape(b2, (1,)).astype(jnp.float32)          # SMEM scalar

    grid = (b_pad // tb,)

    out = pl.pallas_call(
        _mlp_kernel,
        out_shape=jax.ShapeDtypeStruct((b_pad, 1), jnp.float32),
        grid=grid,
        in_specs=[
            # streaming input: one batch tile per grid step (double-buffered)
            pl.BlockSpec((tb, input_size), lambda i: (i, 0)),
            # parameters: constant index_map -> fetched once, VMEM-resident
            pl.BlockSpec((input_size, HIDDEN), lambda i: (0, 0)),
            pl.BlockSpec((1, HIDDEN), lambda i: (0, 0)),
            pl.BlockSpec((1, HIDDEN), lambda i: (0, 0)),
            # b2 as an SMEM scalar (avoids a padded (8,128) VMEM tile + DMA)
            pl.BlockSpec(memory_space=pltpu.MemorySpace.SMEM),
        ],
        out_specs=pl.BlockSpec((tb, 1), lambda i: (i, 0)),
        compiler_params=pltpu.CompilerParams(
            dimension_semantics=("parallel",),  # shard batch tiles across TCs (v7x)
        ),
        cost_estimate=pl.CostEstimate(
            flops=2 * b_pad * input_size * HIDDEN + 4 * b_pad * HIDDEN,
            transcendentals=b_pad * HIDDEN,
            bytes_accessed=4 * (b_pad * input_size + input_size * HIDDEN
                                + 2 * HIDDEN + 1 + b_pad),
        ),
    )(x_p, w1, b1_row, w2_row, b2_vec)
    return out[:B]


def init_params(input_size, key):
    """Deterministic init mimicking PyTorch nn.Linear (uniform +/- 1/sqrt(fan_in))."""
    k1, k2, k3, k4 = jax.random.split(key, 4)
    bound1 = 1.0 / math.sqrt(input_size)
    w1 = jax.random.uniform(k1, (input_size, HIDDEN), jnp.float32, -bound1, bound1)
    b1 = jax.random.uniform(k2, (1, HIDDEN), jnp.float32, -bound1, bound1)
    bound2 = 1.0 / math.sqrt(HIDDEN)
    w2 = jax.random.uniform(k3, (HIDDEN, 1), jnp.float32, -bound2, bound2)
    b2 = jax.random.uniform(k4, (1, 1), jnp.float32, -bound2, bound2)
    return w1, b1, w2, b2


def _reference(x, w1, b1, w2, b2):
    return jnp.tanh(x @ w1 + b1.reshape(1, -1)) @ w2 + b2.reshape(1, 1)


if __name__ == "__main__":
    key = jax.random.PRNGKey(0)
    kx, kp, kx2 = jax.random.split(key, 3)

    # Small shape consistent with the module (batch=8, inputSize=32).
    batch, input_size = 8, 32
    x = jax.random.normal(kx, (batch, input_size), jnp.float32)
    w1, b1, w2, b2 = init_params(input_size, kp)

    out = jax.block_until_ready(second_modele_forward(x, w1, b1, w2, b2))
    ref = _reference(x, w1, b1, w2, b2)
    assert out.shape == (batch, 1)
    assert jnp.allclose(out, ref, atol=1e-5, rtol=1e-5)

    # Larger, ragged batch: exercises the multi-tile grid + padding path.
    big_batch = 2048 + 300
    xb = jax.random.normal(kx2, (big_batch, input_size), jnp.float32)
    outb = jax.block_until_ready(second_modele_forward(xb, w1, b1, w2, b2))
    refb = _reference(xb, w1, b1, w2, b2)
    assert outb.shape == (big_batch, 1)
    assert jnp.allclose(outb, refb, atol=1e-5, rtol=1e-5)

    print("KERNEL_OK")
</pallas_src>

<mosaic_0001>
module attributes {stable_mosaic.version = 11 : i64} {
  func.func @_mlp_kernel(%arg0: i32, %arg1: memref<8x32xf32, #tpu.memory_space<vmem>>, %arg2: memref<32x16xf32, #tpu.memory_space<vmem>>, %arg3: memref<1x16xf32, #tpu.memory_space<vmem>>, %arg4: memref<1x16xf32, #tpu.memory_space<vmem>>, %arg5: memref<1xf32, #tpu.memory_space<smem>>, %arg6: memref<8x1xf32, #tpu.memory_space<vmem>>) attributes {dimension_semantics = [#tpu.dimension_semantics<parallel>], iteration_bounds = array<i64: 1>, scalar_prefetch = 0 : i64, scratch_operands = 0 : i64, tpu.core_type = #tpu.core_type<tc>, window_params = [{transform_indices = @transform_0, window_bounds = array<i64: 8, 32>}, {pipeline_mode = #tpu.pipeline_mode<synchronous>, transform_indices = @transform_1, window_bounds = array<i64: 32, 16>}, {pipeline_mode = #tpu.pipeline_mode<synchronous>, transform_indices = @transform_2, window_bounds = array<i64: 1, 16>}, {pipeline_mode = #tpu.pipeline_mode<synchronous>, transform_indices = @transform_3, window_bounds = array<i64: 1, 16>}, {transform_indices = @transform_4, window_bounds = array<i64: 1>}, {transform_indices = @transform_5, window_bounds = array<i64: 8, 1>}]} {
    %c0 = arith.constant 0 : index
    %c0_0 = arith.constant 0 : index
    %0 = vector.load %arg1[%c0, %c0_0] : memref<8x32xf32, #tpu.memory_space<vmem>>, vector<8x32xf32>
    %c0_1 = arith.constant 0 : index
    %c0_2 = arith.constant 0 : index
    %1 = vector.load %arg2[%c0_1, %c0_2] : memref<32x16xf32, #tpu.memory_space<vmem>>, vector<32x16xf32>
    %cst = arith.constant dense<0.000000e+00> : vector<8x16xf32>
    %2 = tpu.matmul %0, %1, %cst {dimension_numbers = #tpu.dot_dimension_numbers<[1], [0], [0], [1], [0, 0, 1, 1], [], []>} : vector<8x32xf32>, vector<32x16xf32>, vector<8x16xf32> -> vector<8x16xf32>
    %c0_3 = arith.constant 0 : index
    %c0_4 = arith.constant 0 : index
    %3 = vector.load %arg3[%c0_3, %c0_4] : memref<1x16xf32, #tpu.memory_space<vmem>>, vector<1x16xf32>
    %4 = vector.broadcast %3 : vector<1x16xf32> to vector<8x16xf32>
    %5 = arith.addf %2, %4 : vector<8x16xf32>
    %6 = math.tanh %5 : vector<8x16xf32>
    %c0_5 = arith.constant 0 : index
    %c0_6 = arith.constant 0 : index
    %7 = vector.load %arg4[%c0_5, %c0_6] : memref<1x16xf32, #tpu.memory_space<vmem>>, vector<1x16xf32>
    %8 = vector.broadcast %7 : vector<1x16xf32> to vector<8x16xf32>
    %9 = arith.mulf %6, %8 : vector<8x16xf32>
    %cst_7 = arith.constant dense<0.000000e+00> : vector<8xf32>
    %10 = vector.multi_reduction <add>, %9, %cst_7 [1] : vector<8x16xf32> to vector<8xf32>
    %11 = vector.shape_cast %10 : vector<8xf32> to vector<8x1xf32>
    %c0_8 = arith.constant 0 : index
    %12 = memref.load %arg5[%c0_8] : memref<1xf32, #tpu.memory_space<smem>>
    %13 = vector.broadcast %12 : f32 to vector<8x1xf32>
    %14 = arith.addf %11, %13 : vector<8x1xf32>
    %c0_9 = arith.constant 0 : index
    %c0_10 = arith.constant 0 : index
    %15 = vector.load %arg6[%c0_9, %c0_10] : memref<8x1xf32, #tpu.memory_space<vmem>>, vector<8x1xf32>
    tpu.vector_store %arg6[%c0_9, %c0_10], %14 {strides = array<i32>} : memref<8x1xf32, #tpu.memory_space<vmem>>, vector<8x1xf32>,
    return
  }
  func.func @transform_0(%arg0: i32) -> (i32, i32) {
    %c0_i32 = arith.constant 0 : i32
    %c0_i32_0 = arith.constant 0 : i32
    return %arg0, %c0_i32 : i32, i32
  }
  func.func @transform_1(%arg0: i32) -> (i32, i32) {
    %c0_i32 = arith.constant 0 : i32
    %c0_i32_0 = arith.constant 0 : i32
    %c0_i32_1 = arith.constant 0 : i32
    return %c0_i32, %c0_i32_0 : i32, i32
  }
  func.func @transform_2(%arg0: i32) -> (i32, i32) {
    %c0_i32 = arith.constant 0 : i32
    %c0_i32_0 = arith.constant 0 : i32
    %c0_i32_1 = arith.constant 0 : i32
    return %c0_i32, %c0_i32_0 : i32, i32
  }
  func.func @transform_3(%arg0: i32) -> (i32, i32) {
    %c0_i32 = arith.constant 0 : i32
    %c0_i32_0 = arith.constant 0 : i32
    %c0_i32_1 = arith.constant 0 : i32
    return %c0_i32, %c0_i32_0 : i32, i32
  }
  func.func @transform_4(%arg0: i32) -> i32 {
    %c0_i32 = arith.constant 0 : i32
    %c0_i32_0 = arith.constant 0 : i32
    return %c0_i32 : i32
  }
  func.func @transform_5(%arg0: i32) -> (i32, i32) {
    %c0_i32 = arith.constant 0 : i32
    %c0_i32_0 = arith.constant 0 : i32
    return %arg0, %c0_i32 : i32, i32
  }
}

</mosaic_0001>

<bundles_post_ra>
// kernel: second_modele_forward.1
= control target key start
LH: loop header
LB: loop body
LE: loop exit
PB: predicated region body
PF: predicated region fallthrough
CT: control target
= control target key end

     0   :  { %vm30_vm0 = vcmask 261120   ;;  %vm60_vm1 = vcmask 130048   ;;  %vm67_vm2 = vcmask 7168   ;;  %s135_s1 = inlined_call_operand.vmem [shape: f32[32,16], index: 1, kind: input, shape index: {}]   ;;  %s136_s2 = inlined_call_operand.vmem [shape: f32[1,16], index: 2, kind: input, shape index: {}]   ;;  %s137_s0 = inlined_call_operand.vmem [shape: f32[8,32], index: 0, kind: input, shape index: {}]   ;;  %s138_s3 = inlined_call_operand.vmem [shape: f32[1,16], index: 3, kind: input, shape index: {}]   ;;  %s139_s4 = inlined_call_operand.<no memory space> [shape: f32[1], index: 4, kind: input, shape index: {}]   ;;  %s140_s5 = inlined_call_operand.vmem [shape: f32[8,1], index: 5, kind: output, shape index: {}]  }
   0x1   :  { %v25_v0 = vld [vmem:[%s135_s1 + $0x18] sm:$0xff]  ;;  %v24_v1 = vld [vmem:[%s135_s1 + $0x10] sm:$0xff]  ;;  %v23_v2 = vld [vmem:[%s135_s1 + $0x8] sm:$0xff]  ;;  %v65_v12 = vstv %s139_s4 }
   0x2   :  { %46 = vmatpush.msra.mxu0 %v25_v0  ;;  %v22_v3 = vld [vmem:[%s135_s1] sm:$0xff] }
   0x3   :  { %v21_v4 = vld [vmem:[%s137_s0] sm:$0xff] }
   0x4   :  { %47 = vmatpush.msra.mxu0 %v24_v1  ;;  %v74_v5 = vld [vmem:[%s136_s2] ss:$0 sm:$0xff] }
   0x5   :  { %v75_v8 = vld [vmem:[%s138_s3] ss:$0 sm:$0xff] }
   0x6   :  { %48 = vmatpush.msra.mxu0 %v23_v2 }
   0x8   :  { %49 = vmatpush.msra.mxu0 %v22_v3 }
   0x9   :  { %73 = vmatmul.msk.f32.vlgmr.msra.gmra.mxu0 %vm30_vm0, %v21_v4 }
  0x86   :  { %v51_v6 = vpop.f32.mrf.mxu0 }
  0x87   :  { %v52_v7 = vadd.f32 %v74_v5, %v51_v6 }
  0x89   :  { %76 = vtanh.f32 %v52_v7 }
  0x8f   :  { %v77_v9 = vpop.eup %76 }
  0x90   :  { %v59_v10 = vmul.f32 %v77_v9, %v75_v8 }
  0x92   :  { %v61_v11 = vsel %vm60_vm1, %v59_v10, 0.0 }
  0x93   :  { %62 = vadd.xlane.f32.xlu0 %v61_v11 }
 0x106   :  { %v63_v13 = vpop.xlane.xlu0 %62 }
 0x107   :  { %v66_v14 = vadd.f32 %v65_v12, %v63_v13 }
 0x109   :  { %68 = vst.msk [vmem:[%s140_s5] sm:$0xff] %vm67_vm2, %v66_v14 }

</bundles_post_ra>
